<compile_context>
chip_gen: v5e
topology: v5e:2x2
jax: 0.10.0
libtpu: 0.0.40
codegen_flags: <defaults>
</compile_context>

<pallas_src>
import jax
import jax.numpy as jnp
from jax.experimental import pallas as pl
from jax.experimental.pallas import tpu as pltpu

NFEATURES = 3
HIDDEN = 50
NCLASSES = 2


def _round_up(n, m):
    return ((n + m - 1) // m) * m


def _mlp_kernel(x_ref, w1_ref, b1_ref, w2_ref, b2_ref, w3_ref, b3_ref, o_ref):
    x = x_ref[...]                                                     # (NFEATURES, TB)

    z1 = jnp.dot(w1_ref[...], x, preferred_element_type=jnp.float32) + b1_ref[...]
    a1 = jax.nn.sigmoid(z1)                                            # (HIDDEN, TB)

    z2 = jnp.dot(w2_ref[...], a1, preferred_element_type=jnp.float32) + b2_ref[...]
    a2 = jax.nn.sigmoid(z2)                                            # (HIDDEN, TB)

    z3 = jnp.dot(w3_ref[...], a2, preferred_element_type=jnp.float32) + b3_ref[...]
    a3 = jax.nn.sigmoid(z3)                                            # (NCLASSES, TB)

    # 2-class softmax closed form: softmax([a, b]) = [sigmoid(a-b), 1 - sigmoid(a-b)].
    d = a3[0:1, :] - a3[1:2, :]                                        # (1, TB)
    p0 = jax.nn.sigmoid(d)
    o_ref[0:1, :] = p0
    o_ref[1:2, :] = 1.0 - p0


def band_gap_classifier_forward(x, params, tb=1024):
    """x: (B, NFEATURES) float32. Returns (B, NCLASSES) class probabilities."""
    w1, b1, w2, b2, w3, b3 = params
    B = x.shape[0]

    # Layout plumbing in the wrapper: batch onto the lane axis, pad to a lane-aligned tile.
    xt = x.T                                          # (NFEATURES, B)
    tb = min(tb, _round_up(B, 128))                   # batch tile, multiple of 128
    b_pad = _round_up(B, tb)
    if b_pad != B:
        xt = jnp.pad(xt, ((0, 0), (0, b_pad - B)))
    grid = (b_pad // tb,)

    def const_spec(arr):
        nd = arr.ndim
        return pl.BlockSpec(arr.shape, lambda i: (0,) * nd)  # resident, DMA'd once

    out = pl.pallas_call(
        _mlp_kernel,
        out_shape=jax.ShapeDtypeStruct((NCLASSES, b_pad), jnp.float32),
        grid=grid,
        in_specs=[
            pl.BlockSpec((NFEATURES, tb), lambda i: (0, i)),
            const_spec(w1), const_spec(b1),
            const_spec(w2), const_spec(b2),
            const_spec(w3), const_spec(b3),
        ],
        out_specs=pl.BlockSpec((NCLASSES, tb), lambda i: (0, i)),
        compiler_params=pltpu.CompilerParams(
            dimension_semantics=("parallel",),        # megacore sharding on v7x
            vmem_limit_bytes=32 * 1024 * 1024,        # tiny tiles; ample headroom on all gens
        ),
    )(xt, w1, b1, w2, b2, w3, b3)

    return out[:, :B].T                               # back to (B, NCLASSES)


def init_params(key):
    """Deterministic parameter init (PyTorch Linear-like uniform fan-in init).

    Weights stored as (out, in) (PyTorch layout), biases as (out, 1).
    """
    ks = jax.random.split(key, 6)

    def linear(kw, kb, fan_in, fan_out):
        bound = 1.0 / jnp.sqrt(jnp.float32(fan_in))
        w = jax.random.uniform(kw, (fan_out, fan_in), jnp.float32, -bound, bound)
        b = jax.random.uniform(kb, (fan_out, 1), jnp.float32, -bound, bound)
        return w, b

    w1, b1 = linear(ks[0], ks[1], NFEATURES, HIDDEN)
    w2, b2 = linear(ks[2], ks[3], HIDDEN, HIDDEN)
    w3, b3 = linear(ks[4], ks[5], HIDDEN, NCLASSES)
    return (w1, b1, w2, b2, w3, b3)


def reference_forward(x, params):
    w1, b1, w2, b2, w3, b3 = params
    a1 = jax.nn.sigmoid(x @ w1.T + b1.T)
    a2 = jax.nn.sigmoid(a1 @ w2.T + b2.T)
    a3 = jax.nn.sigmoid(a2 @ w3.T + b3.T)
    return jax.nn.softmax(a3, axis=1)


if __name__ == "__main__":
    key = jax.random.PRNGKey(0)
    k_params, k_x1, k_x2 = jax.random.split(key, 3)

    params = init_params(k_params)

    # Small case: batch=8, 3 features (single grid step, padded to 128 lanes).
    x_small = jax.random.normal(k_x1, (8, NFEATURES), jnp.float32)
    y_small = jax.block_until_ready(band_gap_classifier_forward(x_small, params))
    y_small_ref = reference_forward(x_small, params)
    assert y_small.shape == (8, NCLASSES)
    assert jnp.allclose(y_small, y_small_ref, atol=1e-5, rtol=1e-5)
    assert jnp.allclose(jnp.sum(y_small, axis=1), 1.0, atol=1e-5)

    # Ragged case with a multi-step batch grid (tb=128, B=300 -> 3 grid steps + padding).
    x_big = jax.random.normal(k_x2, (300, NFEATURES), jnp.float32)
    y_big = jax.block_until_ready(band_gap_classifier_forward(x_big, params, tb=128))
    y_big_ref = reference_forward(x_big, params)
    assert y_big.shape == (300, NCLASSES)
    assert jnp.allclose(y_big, y_big_ref, atol=1e-5, rtol=1e-5)
    assert jnp.allclose(jnp.sum(y_big, axis=1), 1.0, atol=1e-5)

    print("KERNEL_OK")
</pallas_src>

<mosaic_0001>
module attributes {stable_mosaic.version = 11 : i64} {
  func.func @_mlp_kernel(%arg0: i32, %arg1: memref<3x128xf32, #tpu.memory_space<vmem>>, %arg2: memref<50x3xf32, #tpu.memory_space<vmem>>, %arg3: memref<50x1xf32, #tpu.memory_space<vmem>>, %arg4: memref<50x50xf32, #tpu.memory_space<vmem>>, %arg5: memref<50x1xf32, #tpu.memory_space<vmem>>, %arg6: memref<2x50xf32, #tpu.memory_space<vmem>>, %arg7: memref<2x1xf32, #tpu.memory_space<vmem>>, %arg8: memref<2x128xf32, #tpu.memory_space<vmem>>) attributes {dimension_semantics = [#tpu.dimension_semantics<parallel>], iteration_bounds = array<i64: 1>, scalar_prefetch = 0 : i64, scratch_operands = 0 : i64, tpu.core_type = #tpu.core_type<tc>, window_params = [{transform_indices = @transform_0, window_bounds = array<i64: 3, 128>}, {pipeline_mode = #tpu.pipeline_mode<synchronous>, transform_indices = @transform_1, window_bounds = array<i64: 50, 3>}, {pipeline_mode = #tpu.pipeline_mode<synchronous>, transform_indices = @transform_2, window_bounds = array<i64: 50, 1>}, {pipeline_mode = #tpu.pipeline_mode<synchronous>, transform_indices = @transform_3, window_bounds = array<i64: 50, 50>}, {pipeline_mode = #tpu.pipeline_mode<synchronous>, transform_indices = @transform_4, window_bounds = array<i64: 50, 1>}, {pipeline_mode = #tpu.pipeline_mode<synchronous>, transform_indices = @transform_5, window_bounds = array<i64: 2, 50>}, {pipeline_mode = #tpu.pipeline_mode<synchronous>, transform_indices = @transform_6, window_bounds = array<i64: 2, 1>}, {transform_indices = @transform_7, window_bounds = array<i64: 2, 128>}]} {
    %c0 = arith.constant 0 : index
    %c0_0 = arith.constant 0 : index
    %0 = vector.load %arg1[%c0, %c0_0] : memref<3x128xf32, #tpu.memory_space<vmem>>, vector<3x128xf32>
    %c0_1 = arith.constant 0 : index
    %c0_2 = arith.constant 0 : index
    %1 = vector.load %arg2[%c0_1, %c0_2] : memref<50x3xf32, #tpu.memory_space<vmem>>, vector<50x3xf32>
    %cst = arith.constant dense<0.000000e+00> : vector<50x128xf32>
    %2 = tpu.matmul %1, %0, %cst {dimension_numbers = #tpu.dot_dimension_numbers<[1], [0], [0], [1], [0, 0, 1, 1], [], []>} : vector<50x3xf32>, vector<3x128xf32>, vector<50x128xf32> -> vector<50x128xf32>
    %c0_3 = arith.constant 0 : index
    %c0_4 = arith.constant 0 : index
    %3 = vector.load %arg3[%c0_3, %c0_4] : memref<50x1xf32, #tpu.memory_space<vmem>>, vector<50x1xf32>
    %4 = vector.broadcast %3 : vector<50x1xf32> to vector<50x128xf32>
    %5 = arith.addf %2, %4 : vector<50x128xf32>
    %6 = arith.negf %5 : vector<50x128xf32>
    %7 = math.exp %6 : vector<50x128xf32>
    %cst_5 = arith.constant 1.000000e+00 : f32
    %8 = vector.broadcast %cst_5 : f32 to vector<50x128xf32>
    %9 = arith.addf %8, %7 : vector<50x128xf32>
    %10 = arith.divf %8, %9 : vector<50x128xf32>
    %c0_6 = arith.constant 0 : index
    %c0_7 = arith.constant 0 : index
    %11 = vector.load %arg4[%c0_6, %c0_7] : memref<50x50xf32, #tpu.memory_space<vmem>>, vector<50x50xf32>
    %cst_8 = arith.constant dense<0.000000e+00> : vector<50x128xf32>
    %12 = tpu.matmul %11, %10, %cst_8 {dimension_numbers = #tpu.dot_dimension_numbers<[1], [0], [0], [1], [0, 0, 1, 1], [], []>} : vector<50x50xf32>, vector<50x128xf32>, vector<50x128xf32> -> vector<50x128xf32>
    %c0_9 = arith.constant 0 : index
    %c0_10 = arith.constant 0 : index
    %13 = vector.load %arg5[%c0_9, %c0_10] : memref<50x1xf32, #tpu.memory_space<vmem>>, vector<50x1xf32>
    %14 = vector.broadcast %13 : vector<50x1xf32> to vector<50x128xf32>
    %15 = arith.addf %12, %14 : vector<50x128xf32>
    %16 = arith.negf %15 : vector<50x128xf32>
    %17 = math.exp %16 : vector<50x128xf32>
    %cst_11 = arith.constant 1.000000e+00 : f32
    %18 = vector.broadcast %cst_11 : f32 to vector<50x128xf32>
    %19 = arith.addf %18, %17 : vector<50x128xf32>
    %20 = arith.divf %18, %19 : vector<50x128xf32>
    %c0_12 = arith.constant 0 : index
    %c0_13 = arith.constant 0 : index
    %21 = vector.load %arg6[%c0_12, %c0_13] : memref<2x50xf32, #tpu.memory_space<vmem>>, vector<2x50xf32>
    %cst_14 = arith.constant dense<0.000000e+00> : vector<2x128xf32>
    %22 = tpu.matmul %21, %20, %cst_14 {dimension_numbers = #tpu.dot_dimension_numbers<[1], [0], [0], [1], [0, 0, 1, 1], [], []>} : vector<2x50xf32>, vector<50x128xf32>, vector<2x128xf32> -> vector<2x128xf32>
    %c0_15 = arith.constant 0 : index
    %c0_16 = arith.constant 0 : index
    %23 = vector.load %arg7[%c0_15, %c0_16] : memref<2x1xf32, #tpu.memory_space<vmem>>, vector<2x1xf32>
    %24 = vector.broadcast %23 : vector<2x1xf32> to vector<2x128xf32>
    %25 = arith.addf %22, %24 : vector<2x128xf32>
    %26 = arith.negf %25 : vector<2x128xf32>
    %27 = math.exp %26 : vector<2x128xf32>
    %cst_17 = arith.constant 1.000000e+00 : f32
    %28 = vector.broadcast %cst_17 : f32 to vector<2x128xf32>
    %29 = arith.addf %28, %27 : vector<2x128xf32>
    %30 = arith.divf %28, %29 : vector<2x128xf32>
    %31 = vector.extract_strided_slice %30 {offsets = [0, 0], sizes = [1, 128], strides = [1, 1]} : vector<2x128xf32> to vector<1x128xf32>
    %32 = vector.extract_strided_slice %30 {offsets = [1, 0], sizes = [1, 128], strides = [1, 1]} : vector<2x128xf32> to vector<1x128xf32>
    %33 = arith.subf %31, %32 : vector<1x128xf32>
    %34 = arith.negf %33 : vector<1x128xf32>
    %35 = math.exp %34 : vector<1x128xf32>
    %cst_18 = arith.constant 1.000000e+00 : f32
    %36 = vector.broadcast %cst_18 : f32 to vector<1x128xf32>
    %37 = arith.addf %36, %35 : vector<1x128xf32>
    %38 = arith.divf %36, %37 : vector<1x128xf32>
    %c0_19 = arith.constant 0 : index
    %c0_20 = arith.constant 0 : index
    %39 = vector.load %arg8[%c0_19, %c0_20] : memref<2x128xf32, #tpu.memory_space<vmem>>, vector<1x128xf32>
    tpu.vector_store %arg8[%c0_19, %c0_20], %38 {strides = array<i32>} : memref<2x128xf32, #tpu.memory_space<vmem>>, vector<1x128xf32>,
    %cst_21 = arith.constant 1.000000e+00 : f32
    %40 = vector.broadcast %cst_21 : f32 to vector<1x128xf32>
    %41 = arith.subf %40, %38 : vector<1x128xf32>
    %c1 = arith.constant 1 : index
    %c0_22 = arith.constant 0 : index
    %42 = vector.load %arg8[%c1, %c0_22] : memref<2x128xf32, #tpu.memory_space<vmem>>, vector<1x128xf32>
    tpu.vector_store %arg8[%c1, %c0_22], %41 {strides = array<i32>} : memref<2x128xf32, #tpu.memory_space<vmem>>, vector<1x128xf32>,
    return
  }
  func.func @transform_0(%arg0: i32) -> (i32, i32) {
    %c0_i32 = arith.constant 0 : i32
    %c0_i32_0 = arith.constant 0 : i32
    return %c0_i32, %arg0 : i32, i32
  }
  func.func @transform_1(%arg0: i32) -> (i32, i32) {
    %c0_i32 = arith.constant 0 : i32
    %c0_i32_0 = arith.constant 0 : i32
    %c0_i32_1 = arith.constant 0 : i32
    return %c0_i32, %c0_i32_0 : i32, i32
  }
  func.func @transform_2(%arg0: i32) -> (i32, i32) {
    %c0_i32 = arith.constant 0 : i32
    %c0_i32_0 = arith.constant 0 : i32
    %c0_i32_1 = arith.constant 0 : i32
    return %c0_i32, %c0_i32_0 : i32, i32
  }
  func.func @transform_3(%arg0: i32) -> (i32, i32) {
    %c0_i32 = arith.constant 0 : i32
    %c0_i32_0 = arith.constant 0 : i32
    %c0_i32_1 = arith.constant 0 : i32
    return %c0_i32, %c0_i32_0 : i32, i32
  }
  func.func @transform_4(%arg0: i32) -> (i32, i32) {
    %c0_i32 = arith.constant 0 : i32
    %c0_i32_0 = arith.constant 0 : i32
    %c0_i32_1 = arith.constant 0 : i32
    return %c0_i32, %c0_i32_0 : i32, i32
  }
  func.func @transform_5(%arg0: i32) -> (i32, i32) {
    %c0_i32 = arith.constant 0 : i32
    %c0_i32_0 = arith.constant 0 : i32
    %c0_i32_1 = arith.constant 0 : i32
    return %c0_i32, %c0_i32_0 : i32, i32
  }
  func.func @transform_6(%arg0: i32) -> (i32, i32) {
    %c0_i32 = arith.constant 0 : i32
    %c0_i32_0 = arith.constant 0 : i32
    %c0_i32_1 = arith.constant 0 : i32
    return %c0_i32, %c0_i32_0 : i32, i32
  }
  func.func @transform_7(%arg0: i32) -> (i32, i32) {
    %c0_i32 = arith.constant 0 : i32
    %c0_i32_0 = arith.constant 0 : i32
    return %c0_i32, %arg0 : i32, i32
  }
}

</mosaic_0001>

<bundles_post_ra>
// kernel: tpu_custom_call.1
= control target key start
LH: loop header
LB: loop body
LE: loop exit
PB: predicated region body
PF: predicated region fallthrough
CT: control target
= control target key end

     0   :  { %vm99_vm0 = vcmask 1042432   ;;  %v751_v2 = vmov 0   ;;  %vm77_vm1 = vcmask 23552   ;;  %s1126_s0 = inlined_call_operand.vmem [shape: f32[3,128], index: 0, kind: input, shape index: {}]   ;;  %s1127_s1 = inlined_call_operand.vmem [shape: f32[50,3], index: 1, kind: input, shape index: {}]   ;;  %s1128_s2 = inlined_call_operand.vmem [shape: f32[50,1], index: 2, kind: input, shape index: {}]   ;;  %s1129_s3 = inlined_call_operand.vmem [shape: f32[50,50], index: 3, kind: input, shape index: {}]   ;;  %s1130_s4 = inlined_call_operand.vmem [shape: f32[50,1], index: 4, kind: input, shape index: {}]   ;;  %s1131_s5 = inlined_call_operand.vmem [shape: f32[2,50], index: 5, kind: input, shape index: {}]   ;;  %s1132_s6 = inlined_call_operand.vmem [shape: f32[2,1], index: 6, kind: input, shape index: {}]   ;;  %s1133_s7 = inlined_call_operand.hbm [shape: f32[2,128], index: 7, kind: output, shape index: {}]  }
   0x1   :  { %v27_v0 = vld [vmem:[%s1126_s0] sm:$0x7]  ;;  %v41_v1 = vld [vmem:[%s1128_s2 + $0x30] sm:$0x3]  ;;  %658 = vset.pattern.permute.xlu0 %v751_v2  ;;  %v33_v4 = vld [vmem:[%s1127_s1 + $0x28] sm:$0xff]  ;;  %659 = vset.pattern.permute.xlu1 %v751_v2 }
   0x2   :  { %614 = vmatpush.msk.msra.mxu0 %vm99_vm0, %v27_v0  ;;  %v28_v3 = vld [vmem:[%s1127_s1] sm:$0xff]  ;;  %648 = vmatpush.msk.msra.mxu2 %vm99_vm0, %v27_v0  ;;  %v37_v6 = vld [vmem:[%s1128_s2 + $0x10] sm:$0xff]  ;;  %v40_v7 = vld [vmem:[%s1128_s2 + $0x28] sm:$0xff] }
   0x3   :  { %74 = vperm.xlu0 %658, %v41_v1   ;;  %v39_v5 = vld [vmem:[%s1128_s2 + $0x20] sm:$0xff]  ;;  %615 = vmatmul.msk.f32.vlgmr.msra.gmra.mxu0 %vm77_vm1, %v28_v3  ;;  %v29_v8 = vld [vmem:[%s1127_s1 + $0x8] sm:$0xff]  ;;  %v34_v9 = vld [vmem:[%s1127_s1 + $0x30] sm:$0x3] }
   0x4   :  { %620 = vmatmul.msk.f32.vlgmr.msra.gmra.mxu2 %vm77_vm1, %v33_v4  ;;  %660 = vset.pattern.permute.xlu2 %v751_v2 }
   0x5   :  { %64 = vperm.xlu1 %659, %v39_v5   ;;  %54 = vperm.xlu2 %660, %v37_v6  }
   0x6   :  { %12 = vsyncpa [#allocation3], 0  ;;  %v38_v10 = vld [vmem:[%s1128_s2 + $0x18] sm:$0xff]  ;;  %v36_v11 = vld [vmem:[%s1128_s2 + $0x8] sm:$0xff]  ;;  %vm345_vm8 = vcmask 1041408   ;;  %s605_s11 = sshll.u32 %s1133_s7, 4  ;;  %s606_s11 = int_to_ptr.hbm [resolvable:$true] %s605_s11 }
   0x7   :  { %v35_v12 = vld [vmem:[%s1128_s2] sm:$0xff]  ;;  %v30_v13 = vld [vmem:[%s1127_s1 + $0x10] sm:$0xff]  ;;  %v286_v15 = vld [vmem:[%s1130_s4 + $0x28] sm:$0xff] }
   0x8   :  { %v287_v14 = vld [vmem:[%s1130_s4 + $0x30] sm:$0x3]  ;;  %v285_v16 = vld [vmem:[%s1130_s4 + $0x20] sm:$0xff]  ;;  %v31_v17 = vld [vmem:[%s1127_s1 + $0x18] sm:$0xff] }
   0x9   :  { %v284_v18 = vld [vmem:[%s1130_s4 + $0x18] sm:$0xff]  ;;  %v283_v19 = vld [vmem:[%s1130_s4 + $0x10] sm:$0xff]  ;;  %v282_v20 = vld [vmem:[%s1130_s4 + $0x8] sm:$0xff] }
   0xa   :  { %v32_v21 = vld [vmem:[%s1127_s1 + $0x20] sm:$0xff] }
   0xb   :  { %69 = vperm.xlu0 %658, %v40_v7   ;;  %616 = vmatmul.msk.f32.gmra.mxu0 %vm77_vm1, %v29_v8  ;;  %v281_v22 = vld [vmem:[%s1130_s4] sm:$0xff] }
   0xc   :  { %621 = vmatmul.msk.f32.gmra.mxu2 %vm77_vm1, %v34_v9  ;;  %v521_v23 = vld [vmem:[%s1132_s6] sm:$0x3] }
   0xd   :  { %59 = vperm.xlu1 %659, %v38_v10   ;;  %49 = vperm.xlu2 %660, %v36_v11  }
  0x13   :  { %44 = vperm.xlu0 %658, %v35_v12   ;;  %617 = vmatmul.msk.f32.gmra.mxu0 %vm77_vm1, %v30_v13 }
  0x15   :  { %320 = vperm.xlu1 %659, %v287_v14   ;;  %315 = vperm.xlu2 %660, %v286_v15  }
  0x1b   :  { %310 = vperm.xlu0 %658, %v285_v16   ;;  %618 = vmatmul.msk.f32.gmra.mxu0 %vm77_vm1, %v31_v17 }
  0x1d   :  { %305 = vperm.xlu1 %659, %v284_v18   ;;  %300 = vperm.xlu2 %660, %v283_v19  }
  0x23   :  { %295 = vperm.xlu0 %658, %v282_v20   ;;  %619 = vmatmul.msk.f32.gmra.mxu0 %vm77_vm1, %v32_v21 }
  0x25   :  { %290 = vperm.xlu1 %659, %v281_v22   ;;  %524 = vperm.xlu2 %660, %v521_v23  }
  0x5f   :  { %v55_v26 = vpop.permute.xlu2 %54 }
  0x67   :  { %v50_v32 = vpop.permute.xlu2 %49 }
  0x75   :  { %v75_v24 = vpop.permute.xlu0 %74 }
  0x77   :  { %v65_v33 = vpop.permute.xlu1 %64 }
  0x7d   :  { %v70_v27 = vpop.permute.xlu0 %69 }
  0x7f   :  { %v60_v47 = vpop.permute.xlu1 %59 }
  0x80   :  { %v120_v25 = vpop.f32.mrf.mxu0 }
  0x85   :  { %v45_v37 = vpop.permute.xlu0 %44 }
  0x86   :  { %v121_v44 = vadd.f32 %v120_v25, %v45_v37 }
  0x87   :  { %v135_v28 = vpop.f32.mrf.mxu2 }
  0x88   :  { %v136_v29 = vadd.f32 %v135_v28, %v70_v27  ;;  %v123_v30 = vpop.f32.mrf.mxu0  ;;  %v622_v46 = vmul.f32 -1.442695, %v121_v44 }
  0x89   :  { %v124_v34 = vadd.f32 %v123_v30, %v50_v32 }
  0x8a   :  { %v627_v31 = vmul.f32 -1.442695, %v136_v29 }
  0x8b   :  { %v623_v43 = vmul.f32 -1.442695, %v124_v34 }
  0x8c   :  { %661 = vpow2.f32 %v627_v31 }
  0x8f   :  { %v138_v35 = vpop.f32.mrf.mxu2 }
  0x90   :  { %v139_v36 = vadd.f32 %v138_v35, %v75_v24  ;;  %v126_v38 = vpop.f32.mrf.mxu0 }
  0x91   :  { %v127_v41 = vadd.f32 %v126_v38, %v55_v26 }
  0x92   :  { %v662_v39 = vpop.eup %661  ;;  %v628_v40 = vmul.f32 -1.442695, %v139_v36 }
  0x93   :  { %v869_v42 = vadd.f32 1.0, %v662_v39  ;;  %v624_v45 = vmul.f32 -1.442695, %v127_v41 }
  0x94   :  { %663 = vpow2.f32 %v628_v40 }
  0x95   :  { %665 = vrcp.f32 %v869_v42  ;;  %vm249_vm2 = vweird.f32 %v869_v42  ;;  %v253_v7 = vand.u32 2147483647, %v869_v42  ;;  %v255_v9 = vand.u32 2147483648, %v869_v42 }
  0x96   :  { %667 = vpow2.f32 %v623_v43 }
  0x97   :  { %669 = vpow2.f32 %v624_v45  ;;  %v256_v18 = vor.u32 1.1754944e-38, %v255_v9  ;;  %vm254_vm10 = vcmp.eq.f32.partialorder %v253_v7, 8.507059e+37 }
  0x98   :  { %v129_v48 = vpop.f32.mrf.mxu0  ;;  %671 = vpow2.f32 %v622_v46 }
  0x99   :  { %v130_v50 = vadd.f32 %v129_v48, %v60_v47 }
  0x9a   :  { %v664_v49 = vpop.eup %663 }
  0x9b   :  { %v666_v51 = vpop.eup %665  ;;  %v168_v52 = vadd.f32 1.0, %v664_v49  ;;  %v625_v53 = vmul.f32 -1.442695, %v130_v50 }
  0x9c   :  { %v245_v54 = vmul.f32 %v666_v51, %v869_v42  ;;  %v668_v55 = vpop.eup %667  ;;  %vm250_vm3 = vweird.f32 %v666_v51 }
  0x9d   :  { %673 = vrcp.f32 %v168_v52  ;;  %v670_v56 = vpop.eup %669  ;;  %v873_v57 = vadd.f32 1.0, %v668_v55  ;;  %vm264_vm4 = vweird.f32 %v168_v52  ;;  %v270_v8 = vand.u32 2147483648, %v168_v52  ;;  %vm887_vm6 = vmor %vm249_vm2, %vm250_vm3 }
  0x9e   :  { %675 = vpow2.f32 %v625_v53  ;;  %v246_v58 = vsub.f32 1.0, %v245_v54  ;;  %v875_v59 = vadd.f32 1.0, %v670_v56  ;;  %v672_v61 = vpop.eup %671  ;;  %v268_v11 = vand.u32 2147483647, %v168_v52 }
  0x9f   :  { %677 = vrcp.f32 %v873_v57  ;;  %v878_v4 = vadd.f32 1.0, %v672_v61  ;;  %v271_v17 = vor.u32 1.1754944e-38, %v270_v8  ;;  %vm189_vm11 = vweird.f32 %v873_v57 }
  0xa0   :  { %v132_v60 = vpop.f32.mrf.mxu0  ;;  %v247_v3 = vmul.f32 %v666_v51, %v246_v58  ;;  %679 = vrcp.f32 %v875_v59  ;;  %vm269_vm9 = vcmp.eq.f32.partialorder %v268_v11, 8.507059e+37  ;;  %vm204_vm13 = vweird.f32 %v875_v59 }
  0xa1   :  { %v133_v62 = vadd.f32 %v132_v60, %v65_v33  ;;  %v210_v53 = vand.u32 2147483648, %v875_v59  ;;  %v178_v7 = vand.u32 2147483647, %v878_v4 }
  0xa2   :  { %v248_v12 = vadd.f32 %v666_v51, %v247_v3 }
  0xa3   :  { %v674_v63 = vpop.eup %673  ;;  %v626_v1 = vmul.f32 -1.442695, %v133_v62  ;;  %v193_v62 = vand.u32 2147483647, %v873_v57 }
  0xa4   :  { %v676_v0 = vpop.eup %675  ;;  %v260_v2 = vmul.f32 %v674_v63, %v168_v52  ;;  %vm265_vm5 = vweird.f32 %v674_v63  ;;  %v252_v21 = vsel %vm887_vm6, %v666_v51, %v248_v12  ;;  %v208_v52 = vand.u32 2147483647, %v875_v59  ;;  %v274_v12 = vld [vmem:[%s1129_s3] sm:$0xff] }
  0xa5   :  { %v881_v5 = vadd.f32 1.0, %v676_v0  ;;  %681 = vpow2.f32 %v626_v1  ;;  %v891_v14 = vpop.eup %677  ;;  %vm266_vm7 = vmor %vm264_vm4, %vm265_vm5  ;;  %v257_v26 = vsel %vm254_vm10, %v256_v18, %v252_v21  ;;  %v277_v18 = vld [vmem:[%s1129_s3 + $0x18] sm:$0xff] }
  0xa6   :  { %v261_v6 = vsub.f32 1.0, %v260_v2  ;;  %v894_v16 = vpop.eup %679  ;;  %v185_v29 = vmul.f32 %v891_v14, %v873_v57  ;;  %vm190_vm4 = vweird.f32 %v891_v14  ;;  %v211_v2 = vor.u32 1.1754944e-38, %v210_v53 }
  0xa7   :  { %683 = vrcp.f32 %v881_v5  ;;  %v200_v28 = vmul.f32 %v894_v16, %v875_v59  ;;  %vm219_vm15 = vweird.f32 %v881_v5  ;;  %v225_v45 = vand.u32 2147483648, %v881_v5  ;;  %vm955_vm10 = vmor %vm189_vm11, %vm190_vm4 }
  0xa8   :  { %v262_v10 = vmul.f32 %v674_v63, %v261_v6  ;;  %685 = vrcp.f32 %v878_v4  ;;  %v186_v34 = vsub.f32 1.0, %v185_v29  ;;  %vm205_vm0 = vweird.f32 %v894_v16 }
  0xa9   :  { %v201_v32 = vsub.f32 1.0, %v200_v28  ;;  %v223_v49 = vand.u32 2147483647, %v881_v5  ;;  %v226_v60 = vor.u32 1.1754944e-38, %v225_v45  ;;  %vm940_vm6 = vmor %vm204_vm13, %vm205_vm0  ;;  %vm174_vm13 = vweird.f32 %v878_v4 }
  0xaa   :  { %v263_v15 = vadd.f32 %v674_v63, %v262_v10  ;;  %v187_v41 = vmul.f32 %v891_v14, %v186_v34  ;;  %vm194_vm11 = vcmp.eq.f32.partialorder %v193_v62, 8.507059e+37  ;;  %vm323_vm0 = vcmask 408576  }
  0xab   :  { %v682_v19 = vpop.eup %681  ;;  %v202_v39 = vmul.f32 %v894_v16, %v201_v32 }
  0xac   :  { %v267_v20 = vsel %vm266_vm7, %v674_v63, %v263_v15  ;;  %v166_v23 = vadd.f32 1.0, %v682_v19  ;;  %v188_v56 = vadd.f32 %v891_v14, %v187_v41  ;;  %v195_v63 = vand.u32 2147483648, %v873_v57  ;;  %v279_v15 = vld [vmem:[%s1129_s3 + $0x28] sm:$0xff]  ;;  %v321_v19 = vpop.permute.xlu1 %320 }
  0xad   :  { %v898_v22 = vpop.eup %683  ;;  %v272_v24 = vsel %vm269_vm9, %v271_v17, %v267_v20  ;;  %v203_v50 = vadd.f32 %v894_v16, %v202_v39  ;;  %vm224_vm7 = vcmp.eq.f32.partialorder %v223_v49, 8.507059e+37  ;;  %v280_v17 = vld [vmem:[%s1129_s3 + $0x30] sm:$0x3] }
  0xae   :  { %629 = vmatpush.msk.msra.mxu1 %vm345_vm8, %v272_v24  ;;  %649 = vmatpush.msk.msra.mxu3 %vm345_vm8, %v272_v24  ;;  %v215_v25 = vmul.f32 %v898_v22, %v881_v5  ;;  %687 = vrcp.f32 %v166_v23  ;;  %v904_v27 = vpop.eup %685  ;;  %v240_v40 = vand.u32 2147483648, %v166_v23  ;;  %vm220_vm12 = vweird.f32 %v898_v22 }
  0xaf   :  { %v170_v31 = vmul.f32 %v904_v27, %v878_v4  ;;  %v238_v43 = vand.u32 2147483647, %v166_v23  ;;  %vm234_vm1 = vweird.f32 %v166_v23  ;;  %vm923_vm2 = vmor %vm219_vm15, %vm220_vm12  ;;  %v207_v0 = vsel %vm940_vm6, %v894_v16, %v203_v50  ;;  %v276_v16 = vld [vmem:[%s1129_s3 + $0x10] sm:$0xff] }
  0xb0   :  { %359 = vmatpush.msra.mxu1 %v257_v26  ;;  %650 = vmatpush.msra.mxu3 %v257_v26  ;;  %v216_v30 = vsub.f32 1.0, %v215_v25  ;;  %v241_v51 = vor.u32 1.1754944e-38, %v240_v40  ;;  %vm175_vm9 = vweird.f32 %v904_v27  ;;  %v180_v5 = vand.u32 2147483648, %v878_v4  ;;  %v278_v4 = vld [vmem:[%s1129_s3 + $0x20] sm:$0xff]  ;;  %v316_v25 = vpop.permute.xlu2 %315 }
  0xb1   :  { %v171_v37 = vsub.f32 1.0, %v170_v31  ;;  %vm239_vm5 = vcmp.eq.f32.partialorder %v238_v43, 8.507059e+37  ;;  %vm209_vm12 = vcmp.eq.f32.partialorder %v208_v52, 8.507059e+37  ;;  %v192_v6 = vsel %vm955_vm10, %v891_v14, %v188_v56  ;;  %v275_v14 = vld [vmem:[%s1129_s3 + $0x8] sm:$0xff] }
  0xb2   :  { %v217_v36 = vmul.f32 %v898_v22, %v216_v30  ;;  %v212_v8 = vsel %vm209_vm12, %v211_v2, %v207_v0  ;;  %v196_v9 = vor.u32 1.1754944e-38, %v195_v63  ;;  %v181_v11 = vor.u32 1.1754944e-38, %v180_v5 }
  0xb3   :  { %v172_v46 = vmul.f32 %v904_v27, %v171_v37  ;;  %vm179_vm15 = vcmp.eq.f32.partialorder %v178_v7, 8.507059e+37 }
  0xb4   :  { %v688_v33 = vpop.eup %687  ;;  %v218_v44 = vadd.f32 %v898_v22, %v217_v36  ;;  %v197_v10 = vsel %vm194_vm11, %v196_v9, %v192_v6  ;;  %v306_v20 = vpop.permute.xlu1 %305 }
  0xb5   :  { %v230_v35 = vmul.f32 %v688_v33, %v166_v23  ;;  %vm235_vm14 = vweird.f32 %v688_v33  ;;  %v173_v1 = vadd.f32 %v904_v27, %v172_v46 }
  0xb6   :  { %vm236_vm3 = vmor %vm234_vm1, %vm235_vm14  ;;  %v222_v55 = vsel %vm923_vm2, %v898_v22, %v218_v44  ;;  %v311_v22 = vpop.permute.xlu0 %310 }
  0xb7   :  { %v231_v38 = vsub.f32 1.0, %v230_v35  ;;  %v227_v59 = vsel %vm224_vm7, %v226_v60, %v222_v55  ;;  %vm176_vm14 = vmor %vm174_vm13, %vm175_vm9 }
  0xb8   :  { %v177_v57 = vsel %vm176_vm14, %v904_v27, %v173_v1  ;;  %v301_v35 = vpop.permute.xlu2 %300 }
  0xb9   :  { %v232_v42 = vmul.f32 %v688_v33, %v231_v38  ;;  %v182_v13 = vsel %vm179_vm15, %v181_v11, %v177_v57 }
  0xbb   :  { %v233_v47 = vadd.f32 %v688_v33, %v232_v42 }
  0xbc   :  { %v291_v23 = vpop.permute.xlu1 %290 }
  0xbd   :  { %v237_v54 = vsel %vm236_vm3, %v688_v33, %v233_v47 }
  0xbe   :  { %v242_v58 = vsel %vm239_vm5, %v241_v51, %v237_v54  ;;  %v296_v31 = vpop.permute.xlu0 %295 }
  0xbf   :  { %360 = vmatpush.msra.mxu1 %v242_v58  ;;  %651 = vmatpush.msra.mxu3 %v242_v58 }
  0xc1   :  { %361 = vmatpush.msra.mxu1 %v227_v59  ;;  %652 = vmatpush.msra.mxu3 %v227_v59 }
  0xc3   :  { %362 = vmatpush.msra.mxu1 %v212_v8  ;;  %653 = vmatpush.msra.mxu3 %v212_v8 }
  0xc5   :  { %363 = vmatpush.msra.mxu1 %v197_v10  ;;  %654 = vmatpush.msra.mxu3 %v197_v10 }
  0xc7   :  { %364 = vmatpush.msra.mxu1 %v182_v13  ;;  %655 = vmatpush.msra.mxu3 %v182_v13 }
  0xc8   :  { %630 = vmatmul.msk.f32.vlgmr.msra.gmra.mxu1 %vm323_vm0, %v274_v12  ;;  %634 = vmatmul.msk.f32.vlgmr.msra.gmra.mxu3 %vm323_vm0, %v278_v4 }
  0xd0   :  { %631 = vmatmul.msk.f32.gmra.mxu1 %vm323_vm0, %v275_v14  ;;  %635 = vmatmul.msk.f32.gmra.mxu3 %vm323_vm0, %v279_v15 }
  0xd8   :  { %632 = vmatmul.msk.f32.gmra.mxu1 %vm323_vm0, %v276_v16  ;;  %636 = vmatmul.msk.f32.gmra.mxu3 %vm323_vm0, %v280_v17 }
  0xe0   :  { %633 = vmatmul.msk.f32.gmra.mxu1 %vm323_vm0, %v277_v18 }
 0x145   :  { %v366_v21 = vpop.f32.mrf.mxu1 }
 0x146   :  { %v367_v24 = vadd.f32 %v366_v21, %v291_v23 }
 0x148   :  { %v637_v28 = vmul.f32 -1.442695, %v367_v24 }
 0x14a   :  { %689 = vpow2.f32 %v637_v28 }
 0x14b   :  { %v378_v26 = vpop.f32.mrf.mxu3 }
 0x14c   :  { %v379_v27 = vadd.f32 %v378_v26, %v311_v22 }
 0x14d   :  { %v369_v29 = vpop.f32.mrf.mxu1 }
 0x14e   :  { %v641_v30 = vmul.f32 -1.442695, %v379_v27  ;;  %v370_v32 = vadd.f32 %v369_v29, %v296_v31 }
 0x150   :  { %691 = vpow2.f32 %v641_v30  ;;  %v638_v36 = vmul.f32 -1.442695, %v370_v32  ;;  %v690_v40 = vpop.eup %689 }
 0x151   :  { %v994_v43 = vadd.f32 1.0, %v690_v40 }
 0x153   :  { %v381_v33 = vpop.f32.mrf.mxu3 }
 0x154   :  { %v382_v34 = vadd.f32 %v381_v33, %v316_v25 }
 0x155   :  { %v372_v37 = vpop.f32.mrf.mxu1 }
 0x156   :  { %v642_v38 = vmul.f32 -1.442695, %v382_v34  ;;  %v373_v39 = vadd.f32 %v372_v37, %v301_v35  ;;  %v692_v41 = vpop.eup %691 }
 0x157   :  { %v996_v44 = vadd.f32 1.0, %v692_v41 }
 0x158   :  { %693 = vpow2.f32 %v642_v38  ;;  %v639_v42 = vmul.f32 -1.442695, %v373_v39 }
 0x159   :  { %695 = vpow2.f32 %v638_v36  ;;  %v484_v13 = vand.u32 2147483647, %v996_v44  ;;  %vm480_vm1 = vweird.f32 %v996_v44  ;;  %v486_v16 = vand.u32 2147483648, %v996_v44 }
 0x15a   :  { %697 = vpow2.f32 %v639_v42 }
 0x15b   :  { %v384_v45 = vpop.f32.mrf.mxu3  ;;  %699 = vrcp.f32 %v994_v43  ;;  %vm1045_vm4 = vcmp.eq.f32.partialorder %v484_v13, 8.507059e+37 }
 0x15c   :  { %v385_v46 = vadd.f32 %v384_v45, %v321_v19  ;;  %701 = vrcp.f32 %v996_v44 }
 0x15d   :  { %v375_v47 = vpop.f32.mrf.mxu1 }
 0x15e   :  { %v694_v48 = vpop.eup %693  ;;  %v643_v49 = vmul.f32 -1.442695, %v385_v46  ;;  %v376_v50 = vadd.f32 %v375_v47, %v306_v20 }
 0x15f   :  { %v696_v51 = vpop.eup %695  ;;  %v1000_v52 = vadd.f32 1.0, %v694_v48 }
 0x160   :  { %v698_v53 = vpop.eup %697  ;;  %703 = vpow2.f32 %v643_v49  ;;  %v640_v54 = vmul.f32 -1.442695, %v376_v50  ;;  %v1005_v56 = vadd.f32 1.0, %v696_v51  ;;  %v487_v50 = vor.u32 1.1754944e-38, %v486_v16 }
 0x161   :  { %705 = vrcp.f32 %v1000_v52  ;;  %v1003_v55 = vadd.f32 1.0, %v698_v53  ;;  %v1007_v58 = vpop.eup %699  ;;  %v499_v19 = vand.u32 2147483647, %v1000_v52  ;;  %vm495_vm5 = vweird.f32 %v1000_v52 }
 0x162   :  { %707 = vpow2.f32 %v640_v54  ;;  %v1009_v60 = vpop.eup %701  ;;  %v416_v3 = vmul.f32 %v1007_v58, %v994_v43  ;;  %v501_v29 = vand.u32 2147483648, %v1000_v52  ;;  %vm421_vm10 = vweird.f32 %v1007_v58 }
 0x163   :  { %709 = vrcp.f32 %v1003_v55  ;;  %v476_v2 = vmul.f32 %v1009_v60, %v996_v44  ;;  %vm481_vm6 = vweird.f32 %v1009_v60  ;;  %vm1060_vm14 = vcmp.eq.f32.partialorder %v499_v19, 8.507059e+37 }
 0x164   :  { %711 = vrcp.f32 %v1005_v56  ;;  %v417_v9 = vsub.f32 1.0, %v416_v3  ;;  %vm1070_vm11 = vmor %vm480_vm1, %vm481_vm6  ;;  %v502_v45 = vor.u32 1.1754944e-38, %v501_v29  ;;  %v454_v54 = vand.u32 2147483647, %v1003_v55 }
 0x165   :  { %v477_v8 = vsub.f32 1.0, %v476_v2 }
 0x166   :  { %v704_v61 = vpop.eup %703  ;;  %v418_v17 = vmul.f32 %v1007_v58, %v417_v9  ;;  %v424_v9 = vand.u32 2147483647, %v994_v43 }
 0x167   :  { %v1013_v62 = vpop.eup %705  ;;  %v414_v63 = vadd.f32 1.0, %v704_v61  ;;  %v478_v15 = vmul.f32 %v1009_v60, %v477_v8 }
 0x168   :  { %v708_v0 = vpop.eup %707  ;;  %v491_v1 = vmul.f32 %v1013_v62, %v1000_v52  ;;  %vm496_vm2 = vweird.f32 %v1013_v62  ;;  %v456_v52 = vand.u32 2147483648, %v1003_v55 }
 0x169   :  { %713 = vrcp.f32 %v414_v63  ;;  %v1017_v59 = vadd.f32 1.0, %v708_v0  ;;  %v1023_v5 = vpop.eup %709  ;;  %v514_v22 = vand.u32 2147483647, %v414_v63  ;;  %v516_v23 = vand.u32 2147483648, %v414_v63  ;;  %vm1053_vm9 = vmor %vm495_vm5, %vm496_vm2 }
 0x16a   :  { %v1026_v6 = vpop.eup %711  ;;  %v492_v7 = vsub.f32 1.0, %v491_v1  ;;  %v446_v57 = vmul.f32 %v1023_v5, %v1003_v55  ;;  %v479_v30 = vadd.f32 %v1009_v60, %v478_v15  ;;  %vm510_vm7 = vweird.f32 %v414_v63 }
 0x16b   :  { %715 = vrcp.f32 %v1017_v59  ;;  %v431_v11 = vmul.f32 %v1026_v6, %v1005_v56  ;;  %vm515_vm13 = vcmp.eq.f32.partialorder %v514_v22, 8.507059e+37  ;;  %v517_v35 = vor.u32 1.1754944e-38, %v516_v23 }
 0x16c   :  { %v493_v4 = vmul.f32 %v1013_v62, %v492_v7  ;;  %v447_v21 = vsub.f32 1.0, %v446_v57  ;;  %v483_v46 = vsel %vm1070_vm11, %v1009_v60, %v479_v30  ;;  %v471_v47 = vand.u32 2147483648, %v1017_v59 }
 0x16d   :  { %v432_v24 = vsub.f32 1.0, %v431_v11  ;;  %vm465_vm2 = vweird.f32 %v1017_v59  ;;  %v469_v44 = vand.u32 2147483647, %v1017_v59  ;;  %vm451_vm1 = vweird.f32 %v1023_v5 }
 0x16e   :  { %v494_v26 = vadd.f32 %v1013_v62, %v493_v4  ;;  %v448_v34 = vmul.f32 %v1023_v5, %v447_v21  ;;  %vm450_vm5 = vweird.f32 %v1003_v55  ;;  %v488_v61 = vsel %vm1045_vm4, %v487_v50, %v483_v46 }
 0x16f   :  { %v714_v10 = vpop.eup %713  ;;  %v433_v37 = vmul.f32 %v1026_v6, %v432_v24  ;;  %vm1101_vm6 = vmor %vm450_vm5, %vm451_vm1  ;;  %v441_v0 = vand.u32 2147483648, %v1005_v56  ;;  %v439_v1 = vand.u32 2147483647, %v1005_v56  ;;  %v457_v3 = vor.u32 1.1754944e-38, %v456_v52 }
 0x170   :  { %v506_v12 = vmul.f32 %v714_v10, %v414_v63  ;;  %vm511_vm3 = vweird.f32 %v714_v10  ;;  %v498_v39 = vsel %vm1053_vm9, %v1013_v62, %v494_v26  ;;  %v449_v48 = vadd.f32 %v1023_v5, %v448_v34 }
 0x171   :  { %v1034_v14 = vpop.eup %715  ;;  %vm512_vm12 = vmor %vm510_vm7, %vm511_vm3  ;;  %v503_v49 = vsel %vm1060_vm14, %v502_v45, %v498_v39  ;;  %v434_v60 = vadd.f32 %v1026_v6, %v433_v37  ;;  %v472_v62 = vor.u32 1.1754944e-38, %v471_v47  ;;  %vm435_vm7 = vweird.f32 %v1005_v56 }
 0x172   :  { %v507_v18 = vsub.f32 1.0, %v506_v12  ;;  %v461_v20 = vmul.f32 %v1034_v14, %v1017_v59  ;;  %vm466_vm15 = vweird.f32 %v1034_v14  ;;  %vm470_vm9 = vcmp.eq.f32.partialorder %v469_v44, 8.507059e+37 }
 0x173   :  { %vm1087_vm3 = vmor %vm465_vm2, %vm466_vm15  ;;  %v453_v55 = vsel %vm1101_vm6, %v1023_v5, %v449_v48  ;;  %v419_v59 = vadd.f32 %v1007_v58, %v418_v17  ;;  %v426_v7 = vand.u32 2147483648, %v994_v43  ;;  %vm440_vm11 = vcmp.eq.f32.partialorder %v439_v1, 8.507059e+37 }
 0x174   :  { %v508_v25 = vmul.f32 %v714_v10, %v507_v18  ;;  %v462_v28 = vsub.f32 1.0, %v461_v20  ;;  %vm425_vm15 = vcmp.eq.f32.partialorder %v424_v9, 8.507059e+37 }
 0x175   :  { %v427_v11 = vor.u32 1.1754944e-38, %v426_v7 }
 0x176   :  { %v509_v31 = vadd.f32 %v714_v10, %v508_v25  ;;  %v463_v33 = vmul.f32 %v1034_v14, %v462_v28 }
 0x178   :  { %v513_v38 = vsel %vm512_vm12, %v714_v10, %v509_v31  ;;  %v464_v41 = vadd.f32 %v1034_v14, %v463_v33  ;;  %vm455_vm12 = vcmp.eq.f32.partialorder %v454_v54, 8.507059e+37  ;;  %v442_v10 = vor.u32 1.1754944e-38, %v441_v0 }
 0x179   :  { %v518_v42 = vsel %vm515_vm13, %v517_v35, %v513_v38  ;;  %vm420_vm13 = vweird.f32 %v994_v43  ;;  %v458_v57 = vsel %vm455_vm12, %v457_v3, %v453_v55  ;;  %v525_v43 = vpop.permute.xlu2 %524 }
 0x17a   :  { %644 = vmatpush.msk.msrb.mxu2 %vm345_vm8, %v518_v42  ;;  %v468_v53 = vsel %vm1087_vm3, %v1034_v14, %v464_v41  ;;  %vm436_vm8 = vweird.f32 %v1026_v6  ;;  %vm422_vm14 = vmor %vm420_vm13, %vm421_vm10 }
 0x17b   :  { %v473_v2 = vsel %vm470_vm9, %v472_v62, %v468_v53  ;;  %vm437_vm4 = vmor %vm435_vm7, %vm436_vm8  ;;  %v423_v56 = vsel %vm422_vm14, %v1007_v58, %v419_v59 }
 0x17c   :  { %543 = vmatpush.msrb.mxu2 %v503_v49  ;;  %v438_v8 = vsel %vm437_vm4, %v1026_v6, %v434_v60  ;;  %v520_v6 = vld [vmem:[%s1131_s5] sm:$0x3]  ;;  %v428_v12 = vsel %vm425_vm15, %v427_v11, %v423_v56  ;;  %s752_s5 = smov [#allocation2]  }
 0x17d   :  { %v443_v5 = vsel %vm440_vm11, %v442_v10, %v438_v8  ;;  %s603_s0 = sshll.u32 %s752_s5, 4  ;;  %s604_s0 = int_to_ptr.vmem [resolvable:$true] %s603_s0 }
 0x17e   :  { %544 = vmatpush.msrb.mxu2 %v488_v61 }
 0x180   :  { %545 = vmatpush.msrb.mxu2 %v473_v2 }
 0x182   :  { %546 = vmatpush.msrb.mxu2 %v458_v57 }
 0x184   :  { %547 = vmatpush.msrb.mxu2 %v443_v5 }
 0x186   :  { %548 = vmatpush.msrb.mxu2 %v428_v12 }
 0x187   :  { %645 = vmatmul.msk.f32.vlgmr.msrb.gmra.mxu2 %vm323_vm0, %v520_v6 }
 0x20a   :  { %v550_v4 = vpop.f32.mrf.mxu2 }
 0x20b   :  { %v551_v13 = vadd.f32 %v550_v4, %v525_v43 }
 0x20d   :  { %v646_v14 = vmul.f32 -1.442695, %v551_v13 }
 0x20f   :  { %717 = vpow2.f32 %v646_v14 }
 0x215   :  { %v718_v15 = vpop.eup %717 }
 0x216   :  { %v556_v16 = vadd.f32 1.0, %v718_v15 }
 0x218   :  { %719 = vrcp.f32 %v556_v16  ;;  %v568_v19 = vand.u32 2147483648, %v556_v16  ;;  %v566_v21 = vand.u32 2147483647, %v556_v16  ;;  %vm562_vm2 = vweird.f32 %v556_v16 }
 0x21a   :  { %v569_v23 = vor.u32 1.1754944e-38, %v568_v19  ;;  %vm567_vm0 = vcmp.eq.f32.partialorder %v566_v21, 8.507059e+37 }
 0x21e   :  { %v720_v58 = vpop.eup %719 }
 0x21f   :  { %v558_v17 = vmul.f32 %v720_v58, %v556_v16  ;;  %vm563_vm10 = vweird.f32 %v720_v58 }
 0x220   :  { %vm564_vm1 = vmor %vm562_vm2, %vm563_vm10 }
 0x221   :  { %v559_v18 = vsub.f32 1.0, %v558_v17 }
 0x223   :  { %v560_v20 = vmul.f32 %v720_v58, %v559_v18 }
 0x225   :  { %v561_v22 = vadd.f32 %v720_v58, %v560_v20 }
 0x227   :  { %v565_v24 = vsel %vm564_vm1, %v720_v58, %v561_v22 }
 0x228   :  { %v570_v25 = vsel %vm567_vm0, %v569_v23, %v565_v24 }
 0x229   :  { %v573_v26 = vrot.slane %v570_v25, 1 }
 0x22b   :  { %v575_v27 = vsub.f32 %v570_v25, %v573_v26 }
 0x22d   :  { %v647_v28 = vmul.f32 -1.442695, %v575_v27 }
 0x22f   :  { %721 = vpow2.f32 %v647_v28 }
 0x235   :  { %v722_v29 = vpop.eup %721 }
 0x236   :  { %v579_v30 = vadd.f32 1.0, %v722_v29 }
 0x238   :  { %723 = vrcp.f32 %v579_v30  ;;  %v591_v34 = vand.u32 2147483648, %v579_v30  ;;  %v589_v36 = vand.u32 2147483647, %v579_v30  ;;  %vm585_vm5 = vweird.f32 %v579_v30 }
 0x23a   :  { %v592_v38 = vor.u32 1.1754944e-38, %v591_v34  ;;  %vm590_vm6 = vcmp.eq.f32.partialorder %v589_v36, 8.507059e+37 }
 0x23e   :  { %v724_v31 = vpop.eup %723 }
 0x23f   :  { %v581_v32 = vmul.f32 %v724_v31, %v579_v30  ;;  %vm586_vm3 = vweird.f32 %v724_v31 }
 0x240   :  { %vm587_vm8 = vmor %vm585_vm5, %vm586_vm3 }
 0x241   :  { %v582_v33 = vsub.f32 1.0, %v581_v32 }
 0x243   :  { %v583_v35 = vmul.f32 %v724_v31, %v582_v33 }
 0x245   :  { %v584_v37 = vadd.f32 %v724_v31, %v583_v35 }
 0x247   :  { %v588_v39 = vsel %vm587_vm8, %v724_v31, %v584_v37 }
 0x248   :  { %v593_v40 = vsel %vm590_vm6, %v592_v38, %v588_v39 }
 0x249   :  { %595 = vst [vmem:[#allocation2] sm:$0x1] %v593_v40  ;;  %v596_v41 = vsub.f32 1.0, %v593_v40 }
 0x24b   :  { %597 = vst [vmem:[#allocation2 + $0x1] sm:$0x1] %v596_v41 }
 0x24c   :  { %608 = dma.vmem_to_hbm [thread:$0]  %s604_s0, 32, %s606_s11, [#allocation3]  }
 0x24d   :  { %749 = dma.done.wait [#allocation3], 32  }
 0x24e   :  { %750 = vsyncadd [#allocation3], 4294967264 }
 0x24f   :  { %613 = vsyncpa [#allocation3], 1 }

</bundles_post_ra>
